<compile_context>
chip_gen: v5e
topology: v5e:2x2
jax: 0.10.0
libtpu: 0.0.40
codegen_flags: <defaults>
</compile_context>

<pallas_src>
import functools

import jax
import jax.numpy as jnp
from jax.experimental import pallas as pl
from jax.experimental.pallas import tpu as pltpu


def _round_up(x, m):
    return (x + m - 1) // m * m


def _cdiv(a, b):
    return -(-a // b)


def _sublane_pack(itemsize):
    # sublane packing factor: 8 for 4-byte, 16 for 2-byte, 32 for 1-byte dtypes
    return max(8, 32 // max(int(itemsize), 1))


def _make_kernel(num_classes, penalty_type, n_total, tile_n, steps_per_core, needs_mask):
    if penalty_type not in ("linear", "squared"):
        raise ValueError("Invalid penalty type. Choose 'linear' or 'squared'.")

    def kernel(logits_ref, targets_ref, cw_ref, out_ref, acc_ref):
        i = pl.program_id(1)

        @pl.when(i == 0)
        def _init():
            acc_ref[...] = jnp.zeros_like(acc_ref)

        x = logits_ref[...].astype(jnp.float32)          # (C, TN)  batch on lanes
        t = targets_ref[...].astype(jnp.int32)           # (1, TN)
        cw = cw_ref[...].astype(jnp.float32)             # (C, 1)

        cls = jax.lax.broadcasted_iota(jnp.int32, x.shape, 0)      # class id per row
        onehot = (cls == t).astype(jnp.float32)                    # (C, TN)

        # numerically-stable log-softmax at the target class (sublane reductions)
        xmax = jnp.max(x, axis=0, keepdims=True)                   # (1, TN)
        lse = jnp.log(jnp.sum(jnp.exp(x - xmax), axis=0, keepdims=True)) + xmax
        logp_t = jnp.sum(x * onehot, axis=0, keepdims=True) - lse  # (1, TN)

        # per-sample class weight w[t_i]
        w_t = jnp.sum(onehot * cw, axis=0, keepdims=True)          # (1, TN)

        # argmax along classes (first occurrence, like torch.max)
        is_max = x == xmax
        pred = jnp.min(jnp.where(is_max, cls, num_classes),
                       axis=0, keepdims=True)                      # (1, TN) int32

        dist = jnp.abs(t - pred).astype(jnp.float32)               # (1, TN)
        if penalty_type == "squared":
            dist = dist * dist

        ce_vec = -logp_t * w_t

        def _accumulate(ce_v, w_v, d_v):
            # single full-width RMW instead of three masked sub-slice updates
            acc_ref[...] += jnp.concatenate([ce_v, w_v, d_v], axis=0)

        if needs_mask:
            core = pl.program_id(0)
            global_off = (core * steps_per_core + i) * tile_n
            is_partial = global_off + tile_n > n_total

            @pl.when(is_partial)
            def _masked():
                # where-select (not multiply) so garbage/NaN in the Pallas-padded
                # boundary region can never leak into the sums.
                lane = jax.lax.broadcasted_iota(jnp.int32, (1, tile_n), 1)
                valid = (global_off + lane) < n_total
                _accumulate(jnp.where(valid, ce_vec, 0.0),
                            jnp.where(valid, w_t, 0.0),
                            jnp.where(valid, dist, 0.0))

            @pl.when(jnp.logical_not(is_partial))
            def _full():
                _accumulate(ce_vec, w_t, dist)
        else:
            _accumulate(ce_vec, w_t, dist)

        @pl.when(i == pl.num_programs(1) - 1)
        def _finalize():
            ce_sum = jnp.sum(acc_ref[0:1, :])
            w_sum = jnp.sum(acc_ref[1:2, :])
            d_sum = jnp.sum(acc_ref[2:3, :])
            sub = jax.lax.broadcasted_iota(jnp.int32, (1, 8, 128), 1)
            lane = jax.lax.broadcasted_iota(jnp.int32, (1, 8, 128), 2)
            out_ref[...] = jnp.where((sub == 0) & (lane == 0), ce_sum,
                           jnp.where((sub == 0) & (lane == 1), w_sum,
                           jnp.where((sub == 0) & (lane == 2), d_sum, 0.0)))

    return kernel


@functools.partial(jax.jit, static_argnames=("num_classes", "penalty_type", "tile_n",
                                             "num_core_splits", "logits_buffers",
                                             "logits_are_transposed"))
def distance_weighted_ce_loss(logits, targets, class_weights=None, *,
                              num_classes, weight_factor=1.0,
                              penalty_type="linear", tile_n=None,
                              num_core_splits=2, logits_buffers=2,
                              logits_are_transposed=False):
    """logits: (N, C) float (any dtype) or (C, N) if logits_are_transposed.
    targets: (N,) int (int8/int16/int32 DMA'd natively), class_weights: (C,) or None."""
    assert num_core_splits >= 1
    if logits_are_transposed:
        c, n = logits.shape
        logits_t = logits
    else:
        n, c = logits.shape
        # One extra HBM copy; pass (C, N) + logits_are_transposed=True to avoid it.
        logits_t = jnp.transpose(logits)
    assert c == num_classes

    if class_weights is None:
        class_weights = jnp.ones((c,), jnp.float32)
    cw2d = class_weights.astype(jnp.float32).reshape(c, 1)

    # narrow target dtypes pass through untouched (less HBM traffic), cast in-kernel
    if jnp.issubdtype(targets.dtype, jnp.integer) and jnp.dtype(targets.dtype).itemsize <= 4:
        targets_k = targets
    else:
        targets_k = targets.astype(jnp.int32)
    targets2d = targets_k.reshape(1, n)

    itemsize = jnp.dtype(logits.dtype).itemsize
    t_itemsize = jnp.dtype(targets_k.dtype).itemsize
    c_pad = _round_up(c, _sublane_pack(itemsize))           # dtype-aware sublane pad
    t_pack = _sublane_pack(t_itemsize)

    # --- generation-aware VMEM budget & auto tile derivation ---
    try:
        vmem_cap = int(pltpu.get_tpu_info().vmem_capacity_bytes)
    except Exception:
        vmem_cap = 64 * 1024 * 1024                          # v7x-safe fallback
    budget = min(vmem_cap // 2, 64 * 1024 * 1024)            # v5e/v6e: 64 MiB, v7x: 32 MiB
    slack = 2 * 1024 * 1024

    bytes_per_lane = (logits_buffers * c_pad * itemsize      # pipelined logits blocks
                      + 2 * t_pack * t_itemsize              # pipelined targets blocks
                      + 8 * 4)                               # (3, tile) f32 acc, 8-sublane pad

    if tile_n is None:
        tile = (budget - slack) // bytes_per_lane
        tile = min(tile, 65536)                              # diminishing returns past this
    else:
        tile = int(tile_n)
    per_core = _cdiv(n, num_core_splits)
    tile = min(tile, _round_up(per_core, 128))               # don't exceed work per core
    tile = max(128, (tile // 128) * 128)                     # 128-lane multiple

    num_tiles = _cdiv(n, tile)
    steps_per_core = _cdiv(num_tiles, num_core_splits)
    covered = num_core_splits * steps_per_core * tile
    needs_mask = covered != n                                # partial tail and/or phantom tiles
    last_block = num_tiles - 1

    kernel = _make_kernel(num_classes, penalty_type, n, tile, steps_per_core, needs_mask)

    # request only the VMEM the chosen tiles need (+ slack), capped below physical
    est = (logits_buffers * c_pad * tile * itemsize
           + 2 * t_pack * tile * t_itemsize
           + 8 * tile * 4
           + slack)
    vmem_limit = int(max(min(est, vmem_cap - 8 * 1024 * 1024), 4 * 1024 * 1024))

    def _data_idx(ci, si):
        # phantom steps (past the last real block) are clamped and fully masked
        return (0, jnp.minimum(ci * steps_per_core + si, last_block))

    logits_spec_kwargs = {}
    if logits_buffers != 2:
        logits_spec_kwargs["pipeline_mode"] = pl.Buffered(logits_buffers)

    out = pl.pallas_call(
        kernel,
        out_shape=jax.ShapeDtypeStruct((num_core_splits, 8, 128), jnp.float32),
        grid_spec=pltpu.PrefetchScalarGridSpec(
            num_scalar_prefetch=0,
            grid=(num_core_splits, steps_per_core),
            in_specs=[
                pl.BlockSpec((c, tile), _data_idx, **logits_spec_kwargs),  # lane-dense logits
                pl.BlockSpec((1, tile), _data_idx),                        # lane-dense targets
                pl.BlockSpec((c, 1), lambda ci, si: (0, 0)),               # resident class weights
            ],
            out_specs=pl.BlockSpec((1, 8, 128), lambda ci, si: (ci, 0, 0)),
            scratch_shapes=[pltpu.VMEM((3, tile), jnp.float32)],
        ),
        compiler_params=pltpu.CompilerParams(
            dimension_semantics=("parallel", "arbitrary"),
            vmem_limit_bytes=vmem_limit,
        ),
    )(logits_t, targets2d, cw2d)

    # final 6-scalar combine in the wrapper (per-core partial sums)
    ce_sum = jnp.sum(out[:, 0, 0])
    w_sum = jnp.sum(out[:, 0, 1])
    dist_sum = jnp.sum(out[:, 0, 2])
    return ce_sum / w_sum + weight_factor * (dist_sum / float(n))


def _reference(logits, targets, class_weights, weight_factor, penalty_type):
    # plain-JAX reference mirroring the PyTorch module
    logp = jax.nn.log_softmax(logits.astype(jnp.float32), axis=-1)
    logp_t = jnp.take_along_axis(logp, targets[:, None], axis=-1)[:, 0]
    w_t = class_weights[targets]
    ce = jnp.sum(-logp_t * w_t) / jnp.sum(w_t)
    pred = jnp.argmax(logits, axis=-1).astype(jnp.int32)
    dist = jnp.abs(targets.astype(jnp.int32) - pred).astype(jnp.float32)
    if penalty_type == "squared":
        dist = dist * dist
    return ce + weight_factor * jnp.mean(dist)


if __name__ == "__main__":
    num_classes = 7
    batch = 300                 # not a tile multiple -> exercises tail masking

    key = jax.random.PRNGKey(0)
    k1, k2 = jax.random.split(key)
    logits = jax.random.normal(k1, (batch, num_classes), dtype=jnp.float32)
    targets = jax.random.randint(k2, (batch,), 0, num_classes, dtype=jnp.int32)
    class_weights = 1.0 + 0.1 * jnp.arange(num_classes, dtype=jnp.float32)

    # Test 1: small explicit tile -> multi-step accumulation, partial + phantom tiles,
    # both TensorCore "slots" of the parallel axis.
    loss1 = distance_weighted_ce_loss(
        logits, targets, class_weights,
        num_classes=num_classes, weight_factor=1.0,
        penalty_type="linear", tile_n=128)
    loss1 = jax.block_until_ready(loss1)
    ref1 = _reference(logits, targets, class_weights, 1.0, "linear")
    assert jnp.allclose(loss1, ref1, rtol=1e-5, atol=1e-5), (loss1, ref1)

    # Test 2: auto-derived tile, bf16 logits (native-dtype DMA), squared penalty,
    # default (uniform) class weights.
    logits_bf16 = logits.astype(jnp.bfloat16)
    loss2 = distance_weighted_ce_loss(
        logits_bf16, targets, None,
        num_classes=num_classes, weight_factor=0.5, penalty_type="squared")
    loss2 = jax.block_until_ready(loss2)
    ref2 = _reference(logits_bf16, targets, jnp.ones((num_classes,), jnp.float32),
                      0.5, "squared")
    assert jnp.allclose(loss2, ref2, rtol=1e-4, atol=1e-4), (loss2, ref2)

    print("KERNEL_OK")
</pallas_src>

<mosaic_0001>
module attributes {stable_mosaic.version = 11 : i64} {
  func.func @kernel(%arg0: i32, %arg1: i32, %arg2: memref<7x128xf32, #tpu.memory_space<vmem>>, %arg3: memref<1x128xi32, #tpu.memory_space<vmem>>, %arg4: memref<7x1xf32, #tpu.memory_space<vmem>>, %arg5: memref<1x8x128xf32, #tpu.memory_space<vmem>>, %arg6: memref<3x128xf32, #tpu.memory_space<vmem>>) attributes {dimension_semantics = [#tpu.dimension_semantics<parallel>, #tpu.dimension_semantics<arbitrary>], iteration_bounds = array<i64: 2, 2>, scalar_prefetch = 0 : i64, scratch_operands = 1 : i64, tpu.core_type = #tpu.core_type<tc>, window_params = [{transform_indices = @transform_0, window_bounds = array<i64: 7, 128>}, {transform_indices = @transform_1, window_bounds = array<i64: 1, 128>}, {pipeline_mode = #tpu.pipeline_mode<synchronous>, transform_indices = @transform_2, window_bounds = array<i64: 7, 1>}, {transform_indices = @transform_3, window_bounds = array<i64: 1, 8, 128>}]} {
    %c0_i32 = arith.constant 0 : i32
    %0 = arith.cmpi eq, %arg1, %c0_i32 : i32
    %1 = arith.extui %0 : i1 to i32
    %c0_i32_0 = arith.constant 0 : i32
    %2 = arith.cmpi ne, %1, %c0_i32_0 : i32
    scf.if %2 {
      %cst_15 = arith.constant 0.000000e+00 : f32
      %53 = vector.broadcast %cst_15 : f32 to vector<3x128xf32>
      %c0_16 = arith.constant 0 : index
      %c0_17 = arith.constant 0 : index
      %54 = vector.load %arg6[%c0_16, %c0_17] : memref<3x128xf32, #tpu.memory_space<vmem>>, vector<3x128xf32>
      tpu.vector_store %arg6[%c0_16, %c0_17], %53 {strides = array<i32>} : memref<3x128xf32, #tpu.memory_space<vmem>>, vector<3x128xf32>,
    } else {
    }
    %c0 = arith.constant 0 : index
    %c0_1 = arith.constant 0 : index
    %3 = vector.load %arg2[%c0, %c0_1] : memref<7x128xf32, #tpu.memory_space<vmem>>, vector<7x128xf32>
    %c0_2 = arith.constant 0 : index
    %c0_3 = arith.constant 0 : index
    %4 = vector.load %arg3[%c0_2, %c0_3] : memref<1x128xi32, #tpu.memory_space<vmem>>, vector<1x128xi32>
    %c0_4 = arith.constant 0 : index
    %c0_5 = arith.constant 0 : index
    %5 = vector.load %arg4[%c0_4, %c0_5] : memref<7x1xf32, #tpu.memory_space<vmem>>, vector<7x1xf32>
    %6 = tpu.iota {dimensions = array<i32: 0>} : vector<7x128xi32>
    %7 = vector.broadcast %4 : vector<1x128xi32> to vector<7x128xi32>
    %8 = arith.cmpi eq, %6, %7 : vector<7x128xi32>
    %9 = arith.extui %8 : vector<7x128xi1> to vector<7x128xi32>
    %10 = arith.sitofp %9 : vector<7x128xi32> to vector<7x128xf32>
    %cst = arith.constant dense<0xFF800000> : vector<128xf32>
    %11 = vector.multi_reduction <maximumf>, %3, %cst [0] : vector<7x128xf32> to vector<128xf32>
    %12 = vector.shape_cast %11 : vector<128xf32> to vector<1x128xf32>
    %13 = vector.broadcast %12 : vector<1x128xf32> to vector<7x128xf32>
    %14 = arith.subf %3, %13 : vector<7x128xf32>
    %15 = math.exp %14 : vector<7x128xf32>
    %cst_6 = arith.constant dense<0.000000e+00> : vector<128xf32>
    %16 = vector.multi_reduction <add>, %15, %cst_6 [0] : vector<7x128xf32> to vector<128xf32>
    %17 = vector.shape_cast %16 : vector<128xf32> to vector<1x128xf32>
    %18 = math.log %17 : vector<1x128xf32>
    %19 = arith.addf %18, %12 : vector<1x128xf32>
    %20 = arith.mulf %3, %10 : vector<7x128xf32>
    %cst_7 = arith.constant dense<0.000000e+00> : vector<128xf32>
    %21 = vector.multi_reduction <add>, %20, %cst_7 [0] : vector<7x128xf32> to vector<128xf32>
    %22 = vector.shape_cast %21 : vector<128xf32> to vector<1x128xf32>
    %23 = arith.subf %22, %19 : vector<1x128xf32>
    %24 = vector.broadcast %5 : vector<7x1xf32> to vector<7x128xf32>
    %25 = arith.mulf %10, %24 : vector<7x128xf32>
    %cst_8 = arith.constant dense<0.000000e+00> : vector<128xf32>
    %26 = vector.multi_reduction <add>, %25, %cst_8 [0] : vector<7x128xf32> to vector<128xf32>
    %27 = vector.shape_cast %26 : vector<128xf32> to vector<1x128xf32>
    %28 = vector.broadcast %12 : vector<1x128xf32> to vector<7x128xf32>
    %29 = arith.cmpf oeq, %3, %28 : vector<7x128xf32>
    %c7_i32 = arith.constant 7 : i32
    %30 = vector.broadcast %c7_i32 : i32 to vector<7x128xi32>
    %31 = arith.select %29, %6, %30 : vector<7x128xi1>, vector<7x128xi32>
    %cst_9 = arith.constant dense<2147483647> : vector<128xi32>
    %32 = vector.multi_reduction <minsi>, %31, %cst_9 [0] : vector<7x128xi32> to vector<128xi32>
    %33 = vector.shape_cast %32 : vector<128xi32> to vector<1x128xi32>
    %34 = arith.subi %4, %33 : vector<1x128xi32>
    %35 = math.absi %34 : vector<1x128xi32>
    %36 = arith.sitofp %35 : vector<1x128xi32> to vector<1x128xf32>
    %cst_10 = arith.constant 0.000000e+00 : f32
    %37 = vector.broadcast %cst_10 : f32 to vector<1x128xf32>
    %38 = arith.subf %37, %23 : vector<1x128xf32>
    %39 = arith.mulf %38, %27 : vector<1x128xf32>
    %c2_i32 = arith.constant 2 : i32
    %40 = arith.muli %arg0, %c2_i32 : i32
    %41 = arith.addi %40, %arg1 : i32
    %c128_i32 = arith.constant 128 : i32
    %42 = arith.muli %41, %c128_i32 : i32
    %c128_i32_11 = arith.constant 128 : i32
    %43 = arith.addi %42, %c128_i32_11 : i32
    %c300_i32 = arith.constant 300 : i32
    %44 = arith.cmpi sgt, %43, %c300_i32 : i32
    %45 = arith.extui %44 : i1 to i32
    %c0_i32_12 = arith.constant 0 : i32
    %46 = arith.cmpi ne, %45, %c0_i32_12 : i32
    scf.if %46 {
      %53 = tpu.iota {dimensions = array<i32: 1>} : vector<1x128xi32>
      %54 = vector.broadcast %42 : i32 to vector<1x128xi32>
      %55 = arith.addi %54, %53 : vector<1x128xi32>
      %c300_i32_15 = arith.constant 300 : i32
      %56 = vector.broadcast %c300_i32_15 : i32 to vector<1x128xi32>
      %57 = arith.cmpi slt, %55, %56 : vector<1x128xi32>
      %cst_16 = arith.constant 0.000000e+00 : f32
      %58 = vector.broadcast %cst_16 : f32 to vector<1x128xf32>
      %59 = arith.select %57, %39, %58 : vector<1x128xi1>, vector<1x128xf32>
      %cst_17 = arith.constant 0.000000e+00 : f32
      %60 = vector.broadcast %cst_17 : f32 to vector<1x128xf32>
      %61 = arith.select %57, %27, %60 : vector<1x128xi1>, vector<1x128xf32>
      %cst_18 = arith.constant 0.000000e+00 : f32
      %62 = vector.broadcast %cst_18 : f32 to vector<1x128xf32>
      %63 = arith.select %57, %36, %62 : vector<1x128xi1>, vector<1x128xf32>
      %c0_19 = arith.constant 0 : index
      %c0_20 = arith.constant 0 : index
      %64 = vector.load %arg6[%c0_19, %c0_20] : memref<3x128xf32, #tpu.memory_space<vmem>>, vector<3x128xf32>
      %65 = tpu.concatenate %59, %61, %63 in 0 : vector<1x128xf32>, vector<1x128xf32>, vector<1x128xf32> -> vector<3x128xf32>
      %66 = arith.addf %64, %65 : vector<3x128xf32>
      %c0_21 = arith.constant 0 : index
      %c0_22 = arith.constant 0 : index
      %67 = vector.load %arg6[%c0_21, %c0_22] : memref<3x128xf32, #tpu.memory_space<vmem>>, vector<3x128xf32>
      tpu.vector_store %arg6[%c0_21, %c0_22], %66 {strides = array<i32>} : memref<3x128xf32, #tpu.memory_space<vmem>>, vector<3x128xf32>,
    } else {
    }
    %true = arith.constant true
    %47 = arith.xori %44, %true : i1
    %48 = arith.extui %47 : i1 to i32
    %c0_i32_13 = arith.constant 0 : i32
    %49 = arith.cmpi ne, %48, %c0_i32_13 : i32
    scf.if %49 {
      %c0_15 = arith.constant 0 : index
      %c0_16 = arith.constant 0 : index
      %53 = vector.load %arg6[%c0_15, %c0_16] : memref<3x128xf32, #tpu.memory_space<vmem>>, vector<3x128xf32>
      %54 = tpu.concatenate %39, %27, %36 in 0 : vector<1x128xf32>, vector<1x128xf32>, vector<1x128xf32> -> vector<3x128xf32>
      %55 = arith.addf %53, %54 : vector<3x128xf32>
      %c0_17 = arith.constant 0 : index
      %c0_18 = arith.constant 0 : index
      %56 = vector.load %arg6[%c0_17, %c0_18] : memref<3x128xf32, #tpu.memory_space<vmem>>, vector<3x128xf32>
      tpu.vector_store %arg6[%c0_17, %c0_18], %55 {strides = array<i32>} : memref<3x128xf32, #tpu.memory_space<vmem>>, vector<3x128xf32>,
    } else {
    }
    %c1_i32 = arith.constant 1 : i32
    %50 = arith.cmpi eq, %arg1, %c1_i32 : i32
    %51 = arith.extui %50 : i1 to i32
    %c0_i32_14 = arith.constant 0 : i32
    %52 = arith.cmpi ne, %51, %c0_i32_14 : i32
    scf.if %52 {
      %c0_15 = arith.constant 0 : index
      %c0_16 = arith.constant 0 : index
      %53 = vector.load %arg6[%c0_15, %c0_16] : memref<3x128xf32, #tpu.memory_space<vmem>>, vector<1x128xf32>
      %54 = vector.shape_cast %53 : vector<1x128xf32> to vector<1x1x128xf32>
      %cst_17 = arith.constant dense<0.000000e+00> : vector<1xf32>
      %55 = vector.multi_reduction <add>, %54, %cst_17 [1, 2] : vector<1x1x128xf32> to vector<1xf32>
      %56 = vector.shape_cast %55 : vector<1xf32> to vector<1x1x1xf32>
      %57 = vector.extract %56[0, 0, 0] : f32 from vector<1x1x1xf32>
      %c1 = arith.constant 1 : index
      %c0_18 = arith.constant 0 : index
      %58 = vector.load %arg6[%c1, %c0_18] : memref<3x128xf32, #tpu.memory_space<vmem>>, vector<1x128xf32>
      %59 = vector.shape_cast %58 : vector<1x128xf32> to vector<1x1x128xf32>
      %cst_19 = arith.constant dense<0.000000e+00> : vector<1xf32>
      %60 = vector.multi_reduction <add>, %59, %cst_19 [1, 2] : vector<1x1x128xf32> to vector<1xf32>
      %61 = vector.shape_cast %60 : vector<1xf32> to vector<1x1x1xf32>
      %62 = vector.extract %61[0, 0, 0] : f32 from vector<1x1x1xf32>
      %c2 = arith.constant 2 : index
      %c0_20 = arith.constant 0 : index
      %63 = vector.load %arg6[%c2, %c0_20] : memref<3x128xf32, #tpu.memory_space<vmem>>, vector<1x128xf32>
      %64 = vector.shape_cast %63 : vector<1x128xf32> to vector<1x1x128xf32>
      %cst_21 = arith.constant dense<0.000000e+00> : vector<1xf32>
      %65 = vector.multi_reduction <add>, %64, %cst_21 [1, 2] : vector<1x1x128xf32> to vector<1xf32>
      %66 = vector.shape_cast %65 : vector<1xf32> to vector<1x1x1xf32>
      %67 = vector.extract %66[0, 0, 0] : f32 from vector<1x1x1xf32>
      %68 = tpu.iota {dimensions = array<i32: 1>} : vector<1x8x128xi32>
      %69 = tpu.iota {dimensions = array<i32: 2>} : vector<1x8x128xi32>
      %c0_i32_22 = arith.constant 0 : i32
      %70 = vector.broadcast %c0_i32_22 : i32 to vector<1x8x128xi32>
      %71 = arith.cmpi eq, %68, %70 : vector<1x8x128xi32>
      %c0_i32_23 = arith.constant 0 : i32
      %72 = vector.broadcast %c0_i32_23 : i32 to vector<1x8x128xi32>
      %73 = arith.cmpi eq, %69, %72 : vector<1x8x128xi32>
      %74 = arith.andi %71, %73 : vector<1x8x128xi1>
      %c0_i32_24 = arith.constant 0 : i32
      %75 = vector.broadcast %c0_i32_24 : i32 to vector<1x8x128xi32>
      %76 = arith.cmpi eq, %68, %75 : vector<1x8x128xi32>
      %c1_i32_25 = arith.constant 1 : i32
      %77 = vector.broadcast %c1_i32_25 : i32 to vector<1x8x128xi32>
      %78 = arith.cmpi eq, %69, %77 : vector<1x8x128xi32>
      %79 = arith.andi %76, %78 : vector<1x8x128xi1>
      %c0_i32_26 = arith.constant 0 : i32
      %80 = vector.broadcast %c0_i32_26 : i32 to vector<1x8x128xi32>
      %81 = arith.cmpi eq, %68, %80 : vector<1x8x128xi32>
      %c2_i32_27 = arith.constant 2 : i32
      %82 = vector.broadcast %c2_i32_27 : i32 to vector<1x8x128xi32>
      %83 = arith.cmpi eq, %69, %82 : vector<1x8x128xi32>
      %84 = arith.andi %81, %83 : vector<1x8x128xi1>
      %cst_28 = arith.constant 0.000000e+00 : f32
      %85 = vector.broadcast %67 : f32 to vector<1x8x128xf32>
      %86 = vector.broadcast %cst_28 : f32 to vector<1x8x128xf32>
      %87 = arith.select %84, %85, %86 : vector<1x8x128xi1>, vector<1x8x128xf32>
      %88 = vector.broadcast %62 : f32 to vector<1x8x128xf32>
      %89 = arith.select %79, %88, %87 : vector<1x8x128xi1>, vector<1x8x128xf32>
      %90 = vector.broadcast %57 : f32 to vector<1x8x128xf32>
      %91 = arith.select %74, %90, %89 : vector<1x8x128xi1>, vector<1x8x128xf32>
      %c0_29 = arith.constant 0 : index
      %c0_30 = arith.constant 0 : index
      %c0_31 = arith.constant 0 : index
      %92 = vector.load %arg5[%c0_29, %c0_30, %c0_31] : memref<1x8x128xf32, #tpu.memory_space<vmem>>, vector<1x8x128xf32>
      tpu.vector_store %arg5[%c0_29, %c0_30, %c0_31], %91 {strides = array<i32>} : memref<1x8x128xf32, #tpu.memory_space<vmem>>, vector<1x8x128xf32>,
    } else {
    }
    return
  }
  func.func @transform_0(%arg0: i32, %arg1: i32) -> (i32, i32) {
    %c2_i32 = arith.constant 2 : i32
    %0 = arith.muli %arg0, %c2_i32 : i32
    %1 = arith.addi %0, %arg1 : i32
    %c2_i32_0 = arith.constant 2 : i32
    %2 = arith.minsi %1, %c2_i32_0 : i32
    %c0_i32 = arith.constant 0 : i32
    %c0_i32_1 = arith.constant 0 : i32
    return %c0_i32, %2 : i32, i32
  }
  func.func @transform_1(%arg0: i32, %arg1: i32) -> (i32, i32) {
    %c2_i32 = arith.constant 2 : i32
    %0 = arith.muli %arg0, %c2_i32 : i32
    %1 = arith.addi %0, %arg1 : i32
    %c2_i32_0 = arith.constant 2 : i32
    %2 = arith.minsi %1, %c2_i32_0 : i32
    %c0_i32 = arith.constant 0 : i32
    %c0_i32_1 = arith.constant 0 : i32
    return %c0_i32, %2 : i32, i32
  }
  func.func @transform_2(%arg0: i32, %arg1: i32) -> (i32, i32) {
    %c0_i32 = arith.constant 0 : i32
    %c0_i32_0 = arith.constant 0 : i32
    %c0_i32_1 = arith.constant 0 : i32
    return %c0_i32, %c0_i32_0 : i32, i32
  }
  func.func @transform_3(%arg0: i32, %arg1: i32) -> (i32, i32, i32) {
    %c0_i32 = arith.constant 0 : i32
    %c0_i32_0 = arith.constant 0 : i32
    %c0_i32_1 = arith.constant 0 : i32
    return %arg0, %c0_i32, %c0_i32_0 : i32, i32, i32
  }
}

</mosaic_0001>

<bundles_post_ra>
// kernel: distance_weighted_ce_loss.1
= control target key start
LH: loop header
LB: loop body
LE: loop exit
PB: predicated region body
PF: predicated region fallthrough
CT: control target
= control target key end

     0   :  { %8 = vsyncpa [#allocation4], 0  ;;  %s901_s0 = inlined_call_operand.hbm [shape: f32[7,300], index: 0, kind: input, shape index: {}]   ;;  %s902_s1 = inlined_call_operand.vmem [shape: s32[1,300], index: 1, kind: input, shape index: {}]   ;;  %s903_s2 = inlined_call_operand.vmem [shape: f32[7,1], index: 2, kind: input, shape index: {}]   ;;  %s904_s3 = inlined_call_operand.vmem [shape: f32[2,8,128], index: 3, kind: output, shape index: {}]  }
   0x1   :  { %10 = vsyncpa [#allocation4 + $0x1], 0  ;;  %s747_s12 = smov 0   ;;  %s749_s13 = smov 0  }
   0x2   :  { %s751_s14 = smov 0   ;;  %s753_s15 = smov 0  }
   0x3   :  { %s755_s16 = smov 0   ;;  %s757_s17 = smov 0  }
   0x4   :  { %s759_s18 = smov 0   ;;  %s761_s19 = smov 0  }
   0x5 LB: > { %s513_s20 = sadd.s32 4294967295, %s722_s19   ;;  %s25_s21 = sadd.s32 1, %s714_s17  ;;  %s722_s19 = sphi %s761_s19, %s16_s19   ;;  %s718_s18 = sphi %s759_s18, %s913_s18   ;;  %s714_s17 = sphi %s757_s17, %s912_s17   ;;  %s710_s16 = sphi %s755_s16, %s911_s16   ;;  %s706_s15 = sphi %s753_s15, %s910_s15   ;;  %s702_s14 = sphi %s751_s14, %s909_s14   ;;  %s698_s13 = sphi %s749_s13, %s908_s13   ;;  %s694_s12 = sphi %s747_s12, %s907_s12  }
   0x6   : > { %p26_p0 = scmp.ge.s32.totalorder %s25_s21, 2  ;;  %s28_s22 = sadd.s32 1, %s718_s18 }
   0x7   : > { %s515_s23 = sshll.u32 %s718_s18, 1  ;;  %s43_s24 = sadd.s32 1, %s702_s14 }
   0x8   : > { %s915_s21 = smov (%p26_p0, %s25_s21), 0  ;;  %s917_s22 = smov (!%p26_p0, %s28_s22), %s718_s18 }
   0x9   : > { %s33_s25 = sadd.s32 %s714_s17, %s515_s23  ;;  %p50_p1 = scmp.ne.s32.totalorder %s702_s14, %s698_s13 }
   0xa   : > { %p30_p2 = scmp.ge.s32.totalorder %s917_s22, 2  ;;  %p34_p3 = scmp.lt.s32.totalorder %s33_s25, 2 }
   0xb   : > { %p51_p4 = scmp.eq.s32.totalorder %s722_s19, 0  ;;  %p56_p5 = scmp.ne.s32.totalorder %s698_s13, %s694_s12 }
   0xc   : > { %s919_s22 = smov (%p30_p2, %s917_s22), 0  ;;  %s921_s25 = smov (!%p34_p3, %s33_s25), 2 }
   0xd   : > { %s516_s26 = sshll.u32 %s919_s22, 1  ;;  %p801_p6 = por %p51_p4, %p50_p1 }
   0xe   : > { %s37_s28 = sadd.s32 %s516_s26, %s915_s21  ;;  %p57_p7 = scmp.eq.s32.totalorder %s513_s20, 0 }
   0xf   : > { %p38_p8 = scmp.lt.s32.totalorder %s37_s28, 2  ;;  %p552_p10 = scmp.lt.s32.totalorder %s722_s19, 4 }
  0x10   : > { %p806_p9 = por %p57_p7, %p56_p5  ;;  %s164_s30 = sand.u32 1, %s702_s14  }
  0x11   : > { %s923_s28 = smov (!%p38_p8, %s37_s28), 2  ;;  %s523_s4 = sshll.u32 %s921_s25, 3 }
  0x12   : > { %s40_s5 = ssub.s32 %s921_s25, %s923_s28  ;;  %s521_s6 = sshll.u32 %s164_s30, 3 }
  0x13   : > { %p41_p11 = scmp.eq.s32.totalorder %s40_s5, 0  ;;  %s176_s9 = scalar_lea.hbm %s901_s0, %s523_s4 }
  0x14   : > { %s178_s11 = sshll.u32 %s176_s9, 4  ;;  %s168_s12 = scalar_lea.vmem [#allocation3], %s521_s6  ;;  %s179_s11 = int_to_ptr.hbm [resolvable:$true] %s178_s11 }
  0x15   : > { %s816_s10 = scalar_select %p41_p11, %s702_s14, %s43_s24  }
  0x16   : > { %s180_s20 = sshll.u32 %s168_s12, 4  ;;  %p549_p12 = pnand %p552_p10, %p801_p6  ;;  %s181_s20 = int_to_ptr.vmem [resolvable:$true] %s180_s20 }
  0x17   : > { %p524_p13 = scmp.ge.s32.totalorder %s722_s19, 1  ;;  %p199_p0 = scmp.lt.s32.totalorder %s722_s19, 5 }
  0x18   : > { %s165_s23 = scalar_lea.sflag [#allocation4], %s164_s30 }
  0x19   : > { %551 = dma.hbm_to_vmem [thread:$0]  (!%p549_p12), %s179_s11, 128, %s181_s20, %s165_s23  }
  0x1a   : > { %p200_p1 = pnand %p524_p13, %p199_p0 }
  0x1b   : > { %s205_s25 = sand.u32 (!%p200_p1), 1, %s698_s13  }
  0x1c   : > { %203 = sbr.rel (%p200_p1) target bundleno = 403 (0x193), region = 32  ;;  %s525_s26 = sshll.u32 (!%p200_p1), %s205_s25, 3 }
  0x1d   : > { %s206_s24 = scalar_lea.sflag (!%p200_p1), [#allocation4], %s205_s25  ;;  %s209_s28 = scalar_lea.vmem (!%p200_p1), [#allocation3], %s525_s26 }
  0x21   : > { %689 = dma.done.wait (%p806_p9), %s206_s24, 128  }
  0x22   : > { %691 = vsyncadd (%p806_p9), %s206_s24, 4294967168  ;;  %s526_s27 = sshll.u32 %s710_s16, 1  ;;  %p254_p2 = scmp.lt.s32.totalorder %s710_s16, 1 }
  0x23   : > { %s832_s30 = sadd.s32 %s706_s15, %s526_s27  ;;  %p531_p4 = scmp.ne.s32.totalorder %s706_s15, 0 }
  0x24   : > { %p245_p3 = scmp.lt.s32.totalorder %s832_s30, 2  ;;  %s925_s16 = smov (!%p254_p2, %s710_s16), 1 }
  0x25   : > { %s530_s5 = sshll.u32 %s925_s16, 3  ;;  %261 = sbr.rel (%p531_p4) target bundleno = 44 (0x2c), region = 40 }
  0x26   : > { %s246_s4 = scalar_select %p245_p3, %s832_s30, 2 }
  0x27   : > { %s840_s29 = scalar_lea.vmem %s904_s3, %s530_s5 }
  0x28   : > { %s927_s4 = smov (!%p245_p3, %s246_s4), 2 }
  0x29   : > { %s845_s11 = scalar_lea.vmem %s902_s1, %s927_s4 }
  0x2a   : > { %v724_v0 = vmov 0.0  }
  0x2b   : > { %262 = vst [vmem:[#allocation2] sm:$0x7] %v724_v0 }
  0x2c PF: > { %v265_v1 = vld [vmem:[%s903_s2] sm:$0x7f]  ;;  %v725_v2 = vmov 0   ;;  %s534_s16 = sshll.u32 %s832_s30, 7  ;;  %vm272_vm0 = vcmask 1046528   ;;  %v266_v13 = vlaneseq  ;;  %v726_v25 = vmov 0.0  }
  0x2d   : > { %620 = vset.pattern.permute.xlu0 %v725_v2  ;;  %s854_s23 = sadd.s32 128, %s534_s16  ;;  %v263_v3 = vld [vmem:[%s209_s28] sm:$0x7f]  ;;  %v621_v19 = vld [vmem:[%s845_s11] ss:$0 sm:$0xff] }
  0x2e   : > { %304 = vperm.xlu0 %620, %v265_v1   ;;  %v273_v4 = vsel %vm272_vm0, %v263_v3, -inf  ;;  %v858_v15 = vshrl.u32 %v266_v13, 7  ;;  %v264_v30 = vld [vmem:[%s845_s11] sm:$0x1]  ;;  %p535_p5 = scmp.le.s32.totalorder %s854_s23, 300 }
  0x2f   : > { %v274_v5 = vrot.slane %v273_v4, 4 }
  0x30   : > { %vm269_vm3 = vcmp.eq.s32.totalorder %v858_v15, %v621_v19 }
  0x31   : > { %v275_v6 = vmax.f32 %v273_v4, %v274_v5  ;;  %v532_v26 = vsel %vm269_vm3, 1.0, %v726_v25 }
  0x32   : > { %v293_v31 = vmul.f32 %v532_v26, %v263_v3 }
  0x33   : > { %v276_v7 = vrot.slane %v275_v6, 2 }
  0x34   : > { %v294_v35 = vsel %vm272_vm0, %v293_v31, 0.0 }
  0x35   : > { %v277_v8 = vmax.f32 %v275_v6, %v276_v7  ;;  %v295_v39 = vrot.slane %v294_v35, 4 }
  0x37   : > { %v278_v9 = vrot.slane %v277_v8, 1  ;;  %v296_v42 = vadd.f32 %v295_v39, %v294_v35 }
  0x39   : > { %v279_v10 = vmax.f32 %v277_v8, %v278_v9  ;;  %v297_v43 = vrot.slane %v296_v42, 2 }
  0x3b   : > { %v280_v11 = vsub.f32 %v263_v3, %v279_v10  ;;  %vm315_vm1 = vcmp.eq.f32.partialorder %v263_v3, %v279_v10  ;;  %v298_v44 = vadd.f32 %v297_v43, %v296_v42 }
  0x3c   : > { %v316_v17 = vsel %vm315_vm1, %v858_v15, 7 }
  0x3d   : > { %v281_v12 = vmul.f32 1.442695, %v280_v11  ;;  %v317_v18 = vsel %vm272_vm0, %v316_v17, 2147483647  ;;  %v299_v48 = vrot.slane %v298_v44, 1 }
  0x3e   : > { %v318_v21 = vrot.slane %v317_v18, 4 }
  0x3f   : > { %622 = vpow2.f32 %v281_v12  ;;  %v300_v52 = vadd.f32 %v299_v48, %v298_v44 }
  0x40   : > { %vm319_vm2 = vcmp.lt.s32.totalorder %v317_v18, %v318_v21 }
  0x41   : > { %v320_v22 = vsel %vm319_vm2, %v317_v18, %v318_v21 }
  0x42   : > { %v321_v24 = vrot.slane %v320_v22, 2 }
  0x44   : > { %vm322_vm4 = vcmp.lt.s32.totalorder %v320_v22, %v321_v24 }
  0x45   : > { %v623_v14 = vpop.eup %622  ;;  %v323_v27 = vsel %vm322_vm4, %v320_v22, %v321_v24 }
  0x46   : > { %v283_v16 = vsel %vm272_vm0, %v623_v14, 0.0  ;;  %v324_v29 = vrot.slane %v323_v27, 1 }
  0x47   : > { %v284_v20 = vrot.slane %v283_v16, 4 }
  0x48   : > { %vm325_vm5 = vcmp.lt.s32.totalorder %v323_v27, %v324_v29 }
  0x49   : > { %v285_v23 = vadd.f32 %v284_v20, %v283_v16  ;;  %v326_v32 = vsel %vm325_vm5, %v323_v27, %v324_v29 }
  0x4a   : > { %v327_v34 = vsub.s32 %v264_v30, %v326_v32 }
  0x4b   : > { %v286_v28 = vrot.slane %v285_v23, 2 }
  0x4c   : > { %v329_v36 = vsub.s32 0, %v327_v34  ;;  %vm328_vm6 = vcmp.lt.s32.totalorder %v327_v34, 0 }
  0x4d   : > { %v287_v33 = vadd.f32 %v286_v28, %v285_v23 }
  0x4e   : > { %v330_v38 = vsel %vm328_vm6, %v329_v36, %v327_v34 }
  0x4f   : > { %v288_v37 = vrot.slane %v287_v33, 1  ;;  %v331_v40 = vcvt.s32.f32 %v330_v38 }
  0x51   : > { %v289_v41 = vadd.f32 %v288_v37, %v287_v33 }
  0x53   : > { %624 = vlog2.f32 %v289_v41 }
  0x59   : > { %v625_v45 = vpop.eup %624 }
  0x5a   : > { %v291_v47 = vmul.f32 0.6931472, %v625_v45 }
  0x5c   : > { %v292_v51 = vadd.f32 %v291_v47, %v279_v10 }
  0x5e   : > { %v301_v55 = vsub.f32 %v300_v52, %v292_v51 }
  0x60   : > { %v332_v59 = vsub.f32 0.0, %v301_v55 }
  0xa0   : > { %v305_v46 = vpop.permute.xlu0 %304 }
  0xa1   : > { %v307_v49 = vmul.f32 %v532_v26, %v305_v46 }
  0xa3   : > { %v308_v50 = vsel %vm272_vm0, %v307_v49, 0.0 }
  0xa4   : > { %v309_v53 = vrot.slane %v308_v50, 4 }
  0xa6   : > { %v310_v54 = vadd.f32 %v309_v53, %v308_v50 }
  0xa8   : > { %v311_v56 = vrot.slane %v310_v54, 2 }
  0xaa   : > { %v312_v57 = vadd.f32 %v311_v56, %v310_v54 }
  0xac   : > { %v313_v58 = vrot.slane %v312_v57, 1  ;;  %341 = sbr.rel (%p535_p5) target bundleno = 189 (0xbd), region = 44 }
  0xae   : > { %v314_v60 = vadd.f32 %v313_v58, %v312_v57 }
  0xb0   : > { %v333_v61 = vmul.f32 %v332_v59, %v314_v60 }
  0xb1   : > { %v343_v62 = vand.u32 127, %v266_v13  ;;  %v344_v63 = vstv %s534_s16  ;;  %vm354_vm7 = vcmask 1040384   ;;  %vm356_vm9 = vcmask 1041408   ;;  %v350_v4 = vld [vmem:[#allocation2] sm:$0x7] }
  0xb3   : > { %v345_v0 = vadd.s32 %v344_v63, %v343_v62 }
  0xb5   : > { %vm346_vm8 = vcmp.lt.s32.totalorder %v345_v0, 300 }
  0xb6   : > { %v347_v1 = vsel %vm346_vm8, %v333_v61, 0.0  ;;  %v348_v2 = vsel %vm346_vm8, %v314_v60, 0.0  ;;  %v349_v3 = vsel %vm346_vm8, %v331_v40, 0.0 }
  0xb7   : > { %v352_v5 = vrot.slane %v349_v3, 6  ;;  %v355_v6 = vsel %vm354_vm7, %v347_v1, %v348_v2 }
  0xb9   : > { %v357_v7 = vsel %vm356_vm9, %v355_v6, %v352_v5 }
  0xba   : > { %v358_v8 = vadd.f32 %v357_v7, %v350_v4 }
  0xbc   : > { %359 = vst [vmem:[#allocation2] sm:$0x7] %v358_v8 }
  0xbd PF: > { %p536_p6 = scmp.gt.s32.totalorder %s854_s23, 300 }
  0xbf   : > { %363 = sbr.rel (%p536_p6) target bundleno = 202 (0xca), region = 48 }
  0xc4   : > { %v364_v9 = vld [vmem:[#allocation2] sm:$0x7]  ;;  %v366_v10 = vperm.slane %v331_v40, 0  ;;  %vm368_vm10 = vcmask 1040384   ;;  %vm370_vm11 = vcmask 1041408  }
  0xc5   : > { %v369_v11 = vsel %vm368_vm10, %v333_v61, %v314_v60 }
  0xc6   : > { %v371_v12 = vsel %vm370_vm11, %v369_v11, %v366_v10 }
  0xc7   : > { %v372_v14 = vadd.f32 %v371_v12, %v364_v9 }
  0xc9   : > { %373 = vst [vmem:[#allocation2] sm:$0x7] %v372_v14 }
  0xca PF: > { %p537_p7 = scmp.ne.s32.totalorder %s706_s15, 1 }
  0xcc   : > { %377 = sbr.rel (%p537_p7) target bundleno = 403 (0x193), region = 52 }
  0xd1   : > { %v378_v16 = vld [vmem:[#allocation2] sm:$0x1]  ;;  %vm379_vm12 = vcmask 1040384   ;;  %v401_v17 = vld [vmem:[#allocation2 + $0x2] sm:$0x1]  ;;  %v413_v43 = vand.u32 127, %v266_v13 }
  0xd2   : > { %v380_v18 = vsel %vm379_vm12, %v378_v16, 0.0  ;;  %v402_v19 = vsel %vm379_vm12, %v401_v17, 0.0  ;;  %v390_v20 = vld [vmem:[#allocation2 + $0x1] sm:$0x1]  ;;  %vm414_vm13 = vcmp.eq.s32.totalorder %v858_v15, 0 }
  0xd3   : > { %381 = vadd.xlane.f32.xlu0 %v380_v18  ;;  %403 = vadd.xlane.f32.xlu1 %v402_v19  ;;  %v391_v21 = vsel %vm379_vm12, %v390_v20, 0.0  ;;  %vm419_vm14 = vcmp.eq.s32.totalorder %v413_v43, 2  ;;  %vm417_vm15 = vcmp.eq.s32.totalorder %v413_v43, 1  ;;  %vm415_vm0 = vcmp.eq.s32.totalorder %v413_v43, 0 }
  0xd4   : > { %vm420_vm1 = vmand %vm414_vm13, %vm419_vm14 }
  0xd5   : > { %vm418_vm2 = vmand %vm414_vm13, %vm417_vm15 }
  0xd6   : > { %vm416_vm3 = vmand %vm414_vm13, %vm415_vm0 }
  0xdb   : > { %392 = vadd.xlane.f32.xlu0 %v391_v21 }
 0x146   : > { %v382_v22 = vpop.xlane.xlu0 %381  ;;  %v404_v23 = vpop.xlane.xlu1 %403 }
 0x147   : > { %v383_v24 = vrot.slane %v382_v22, 4  ;;  %v405_v25 = vrot.slane %v404_v23, 4 }
 0x149   : > { %v384_v26 = vadd.f32 %v383_v24, %v382_v22  ;;  %v406_v27 = vadd.f32 %v405_v25, %v404_v23 }
 0x14b   : > { %v385_v28 = vrot.slane %v384_v26, 2  ;;  %v407_v30 = vrot.slane %v406_v27, 2 }
 0x14d   : > { %v386_v29 = vadd.f32 %v385_v28, %v384_v26  ;;  %v408_v36 = vadd.f32 %v407_v30, %v406_v27 }
 0x14e   : > { %v393_v31 = vpop.xlane.xlu0 %392 }
 0x14f   : > { %v394_v32 = vrot.slane %v393_v31, 4  ;;  %v387_v33 = vrot.slane %v386_v29, 1  ;;  %v409_v39 = vrot.slane %v408_v36, 1 }
 0x151   : > { %v395_v34 = vadd.f32 %v394_v32, %v393_v31  ;;  %v388_v35 = vadd.f32 %v387_v33, %v386_v29  ;;  %v410_v42 = vadd.f32 %v409_v39, %v408_v36 }
 0x153   : > { %v396_v37 = vrot.slane %v395_v34, 2  ;;  %540 = vpush %v388_v35 }
 0x155   : > { %v397_v38 = vadd.f32 %v396_v37, %v395_v34 }
 0x157   : > { %v398_v40 = vrot.slane %v397_v38, 1 }
 0x159   : > { %v399_v41 = vadd.f32 %v398_v40, %v397_v38 }
 0x15b   : > { %542 = vpush %v399_v41 }
 0x15c   : > { %544 = vpush %v410_v42 }
 0x184   : > { %s541_s15 = spop %540 }
 0x185   : > { %v425_v47 = vstv %s541_s15 }
 0x18c   : > { %s543_s25 = spop %542 }
 0x18d   : > { %v423_v44 = vstv %s543_s25  ;;  %s545_s26 = spop %544 }
 0x18e   : > { %v421_v45 = vstv %s545_s26 }
 0x18f   : > { %v422_v46 = vsel %vm420_vm1, %v421_v45, 0.0 }
 0x190   : > { %v424_v48 = vsel %vm418_vm2, %v423_v44, %v422_v46 }
 0x191   : > { %v426_v49 = vsel %vm416_vm3, %v425_v47, %v424_v48 }
 0x192   : > { %427 = vst [vmem:[%s840_s29] sm:$0xff] %v426_v49 }
 0x193 PF: > { %s16_s19 = sadd.s32 1, %s722_s19   ;;  %s907_s12 = smov %s698_s13 }
 0x194   : > { %p13_p8 = scmp.ge.s32.totalorder %s16_s19, 6   ;;  %s908_s13 = smov %s702_s14 }
 0x195   : > { %s909_s14 = smov %s816_s10  ;;  %s910_s15 = smov %s714_s17 }
 0x196   : > { %s911_s16 = smov %s718_s18  ;;  %s912_s17 = smov %s915_s21 }
 0x197   : > { %s913_s18 = smov %s919_s22  ;;  %15 = sbr.rel (!%p13_p8) target bundleno = 5 (0x5), region = 91 }
 0x19c   :  { %447 = vsyncpa [#allocation4], 1 }
 0x19d   :  { %449 = vsyncpa [#allocation4 + $0x1], 1 }

</bundles_post_ra>
